<compile_context>
chip_gen: v7x
topology: tpu7x:2x2x1
jax: 0.10.0
libtpu: 0.0.40
codegen_flags: <defaults>
</compile_context>

<pallas_src>
import functools

import jax
import jax.numpy as jnp
from jax.experimental import pallas as pl
from jax.experimental.pallas import tpu as pltpu

LN_EPS = 1e-5                       # nn.LayerNorm default eps
_INV_SQRT2 = 0.7071067811865476
_SQRT_2_OVER_PI = 0.7978845608028654


# --------------------------------------------------------------------------- #
# Kernel
# --------------------------------------------------------------------------- #
def _mlp_kernel(x_ref, g_ref, b_ref, w1_ref, b1_ref, w2_ref, b2_ref, o_ref,
                xn_ref, acc_ref, *, use_residual, matmul_dtype, approx_gelu):
    k = pl.program_id(1)

    # ---- k == 0: LayerNorm (f32) once per row tile; cache bf16 xn; zero acc ----
    # NOTE: padded all-zero rows are benign here (centered==0, var==0,
    # rsqrt(eps) finite) and are sliced off in the wrapper. Don't "fix" this.
    @pl.when(k == 0)
    def _init():
        x = x_ref[...].astype(jnp.float32)
        mean = jnp.mean(x, axis=-1, keepdims=True)
        centered = x - mean
        var = jnp.mean(centered * centered, axis=-1, keepdims=True)
        xn = centered * jax.lax.rsqrt(var + LN_EPS)
        xn = xn * g_ref[...] + b_ref[...]
        xn_ref[...] = xn.astype(matmul_dtype)
        acc_ref[...] = jnp.zeros_like(acc_ref)

    # ---- fc1 chunk + GELU, fc2 chunk accumulated in f32 ----
    h = jnp.dot(xn_ref[...], w1_ref[...], preferred_element_type=jnp.float32)
    h = h + b1_ref[...]
    if approx_gelu:
        # tanh approximation: single EUP op (separate VLIW slot); use when the
        # feature dims are small enough that the VALU slot saturates first.
        h = 0.5 * h * (1.0 + jnp.tanh(_SQRT_2_OVER_PI * (h + 0.044715 * h * h * h)))
    else:
        # exact erf form, matching PyTorch nn.GELU() default numerics.
        h = 0.5 * h * (1.0 + jax.lax.erf(h * _INV_SQRT2))
    acc_ref[...] += jnp.dot(h.astype(matmul_dtype), w2_ref[...],
                            preferred_element_type=jnp.float32)

    # ---- last hidden chunk: bias, residual (pre-LN input, f32), writeback ----
    @pl.when(k == pl.num_programs(1) - 1)
    def _finalize():
        y = acc_ref[...] + b2_ref[...]
        if use_residual:
            y = y + x_ref[...].astype(jnp.float32)
        o_ref[...] = y.astype(o_ref.dtype)


# --------------------------------------------------------------------------- #
# Tile / budget selection
# --------------------------------------------------------------------------- #
def _round_up(v, m):
    return (v + m - 1) // m * m


def _device_defaults():
    """Returns (tm_target, vmem_budget_bytes, vmem_physical_bytes, multi_tc)."""
    kind = ""
    try:
        kind = jax.devices()[0].device_kind.lower()
    except Exception:
        pass

    vmem_phys = None
    try:
        info = pltpu.get_tpu_info()
        vmem_phys = getattr(info, "vmem_capacity_bytes", None)
    except Exception:
        vmem_phys = None

    if "v6" in kind:                        # v6e: 1 TC, 128 MiB VMEM, 918 TF/s MXU
        tm_target, phys, multi = 768, 128 << 20, False
    elif "v5p" in kind:                     # v5p: 2 TC megacore, 128 MiB
        tm_target, phys, multi = 512, 128 << 20, True
    elif "v5" in kind:                      # v5e / v5 lite: 1 TC, 128 MiB
        tm_target, phys, multi = 256, 128 << 20, False
    elif "v4" in kind:                      # v4: 2 TC megacore, 128 MiB
        tm_target, phys, multi = 512, 128 << 20, True
    elif "v7" in kind or "7x" in kind:      # v7x: 2 TC, only 64 MiB VMEM per TC
        tm_target, phys, multi = 384, 64 << 20, True
    else:                                   # unknown: conservative (v7x-like)
        tm_target, phys, multi = 256, 64 << 20, True

    if vmem_phys is None:
        vmem_phys = phys
    # ~18% headroom for compiler internal scratch / semaphores / descriptors.
    budget = int(vmem_phys * 0.82)
    return tm_target, budget, vmem_phys, multi


def _footprint(tm, th, in_dim, out_dim, x_bytes, out_bytes, mm_bytes):
    """Conservative per-step VMEM footprint (everything double-buffered)."""
    return (2 * tm * in_dim * x_bytes                       # x rows
            + 2 * tm * out_dim * out_bytes                  # output tile
            + 2 * (in_dim * th + th * out_dim) * mm_bytes   # w1 / w2 chunks
            + 2 * th * 4                                    # b1 chunk
            + 2 * (2 * in_dim + out_dim) * 4                # gamma / beta / b2
            + tm * in_dim * mm_bytes                        # xn scratch (bf16)
            + tm * out_dim * 4)                             # f32 accumulator


def _choose_tm(M, tm_target, multi_core):
    """Sublane-aligned row tile: big, low-padding-waste, >=2 tiles on 2-TC parts."""
    m8 = _round_up(max(M, 1), 8)
    tm_cap = max(8, min(tm_target, m8))
    if multi_core and M > 128:
        # keep >= 2 row tiles so the "parallel" axis can shard across TensorCores
        tm_cap = max(8, min(tm_cap, _round_up(-(-M // 2), 8)))
    # search sublane-aligned tiles in [tm_cap/2, tm_cap] minimizing M-pad waste;
    # prefer the largest tile on ties (keeps the MXU better fed).
    best_tm = tm_cap
    best_waste = _round_up(M, tm_cap) - M
    t = tm_cap - 8
    lo = max(tm_cap // 2, 8)
    while t >= lo and best_waste > 0:
        waste = _round_up(M, t) - M
        if waste < best_waste:
            best_tm, best_waste = t, waste
        t -= 8
    return best_tm


def _choose_th(hidden_pad, in_dim, out_dim, tm, x_bytes, out_bytes, mm_bytes,
               budget):
    """Largest lane-aligned divisor of hidden_pad whose chunks fit the budget."""
    cap = min(hidden_pad, 2048)
    for th in range(cap, 127, -128):
        if hidden_pad % th:
            continue
        if _footprint(tm, th, in_dim, out_dim, x_bytes, out_bytes,
                      mm_bytes) <= budget:
            return th
    return 128  # hidden_pad is always a multiple of 128


# --------------------------------------------------------------------------- #
# Wrapper
# --------------------------------------------------------------------------- #
def mlp_pallas(x, gamma, beta, w1, b1, w2, b2, *, use_residual=True,
               matmul_dtype=jnp.bfloat16, approx_gelu=False,
               tm=None, th=None, vmem_budget=None):
    """x: (..., in_dim) f32 or bf16. Returns same leading shape, out_dim last."""
    in_dim = x.shape[-1]
    hidden_dim = w1.shape[1]
    out_dim = w2.shape[1]
    if use_residual:
        assert in_dim == out_dim, "use_residual=True requires in_dim == out_dim"

    lead_shape = x.shape[:-1]
    x2d = x.reshape(-1, in_dim)
    M = x2d.shape[0]

    mm_bytes = jnp.dtype(matmul_dtype).itemsize
    x_bytes = x.dtype.itemsize
    out_bytes = x_bytes                       # output dtype follows x

    tm_target, auto_budget, vmem_phys, multi_core = _device_defaults()
    budget = auto_budget if vmem_budget is None else int(vmem_budget)

    # Hidden dim zero-padded to a lane-aligned multiple: GELU(0)=0 and padded
    # w2 rows are zero, so padded hidden units contribute exactly 0 to acc.
    hidden_pad = _round_up(hidden_dim, 128)

    # --- VMEM-aware tile selection ---
    if tm is not None:
        tm_sel = max(8, _round_up(min(tm, _round_up(M, 8)), 8))
    else:
        tm_sel = _choose_tm(M, tm_target, multi_core)
    while True:
        if th is not None:
            th_sel = th
        else:
            th_sel = _choose_th(hidden_pad, in_dim, out_dim, tm_sel,
                                x_bytes, out_bytes, mm_bytes, budget)
        fp = _footprint(tm_sel, th_sel, in_dim, out_dim,
                        x_bytes, out_bytes, mm_bytes)
        if fp <= budget or tm_sel <= 8 or tm is not None:
            break
        tm_sel = max(8, _round_up(tm_sel // 2, 8))   # shrink rows until it fits

    M_pad = _round_up(M, tm_sel)
    if M_pad != M:
        x2d = jnp.pad(x2d, ((0, M_pad - M), (0, 0)))
    grid_m = M_pad // tm_sel
    grid_k = hidden_pad // th_sel

    # --- parameter prep: pad hidden axis, cast MXU operands to bf16 once ---
    if hidden_pad != hidden_dim:
        hp = hidden_pad - hidden_dim
        w1 = jnp.pad(w1, ((0, 0), (0, hp)))
        b1 = jnp.pad(b1, ((0, hp),))
        w2 = jnp.pad(w2, ((0, hp), (0, 0)))
    w1m = w1.astype(matmul_dtype)
    w2m = w2.astype(matmul_dtype)
    gamma2 = gamma.reshape(1, in_dim).astype(jnp.float32)
    beta2 = beta.reshape(1, in_dim).astype(jnp.float32)
    b1_2 = b1.reshape(1, hidden_pad).astype(jnp.float32)
    b2_2 = b2.reshape(1, out_dim).astype(jnp.float32)

    vmem_limit = int(min(max(budget, fp + (2 << 20)), vmem_phys))

    kernel = functools.partial(_mlp_kernel, use_residual=use_residual,
                               matmul_dtype=matmul_dtype,
                               approx_gelu=approx_gelu)

    flops = 2 * M_pad * (in_dim * hidden_pad + hidden_pad * out_dim)
    bytes_accessed = (
        M_pad * in_dim * x_bytes
        + M_pad * out_dim * out_bytes
        + grid_m * (in_dim * hidden_pad + hidden_pad * out_dim) * mm_bytes
        + grid_m * (hidden_pad + out_dim + 2 * in_dim) * 4
    )

    out = pl.pallas_call(
        kernel,
        out_shape=jax.ShapeDtypeStruct((M_pad, out_dim), x.dtype),
        grid_spec=pltpu.PrefetchScalarGridSpec(
            num_scalar_prefetch=0,
            grid=(grid_m, grid_k),
            in_specs=[
                pl.BlockSpec((tm_sel, in_dim), lambda i, k: (i, 0)),     # x rows
                pl.BlockSpec((1, in_dim), lambda i, k: (0, 0)),          # ln gamma
                pl.BlockSpec((1, in_dim), lambda i, k: (0, 0)),          # ln beta
                pl.BlockSpec((in_dim, th_sel), lambda i, k: (0, k)),     # w1 chunk
                pl.BlockSpec((1, th_sel), lambda i, k: (0, k)),          # b1 chunk
                pl.BlockSpec((th_sel, out_dim), lambda i, k: (k, 0)),    # w2 chunk
                pl.BlockSpec((1, out_dim), lambda i, k: (0, 0)),         # b2
            ],
            out_specs=pl.BlockSpec((tm_sel, out_dim), lambda i, k: (i, 0)),
            scratch_shapes=[
                pltpu.VMEM((tm_sel, in_dim), matmul_dtype),  # cached LN output
                pltpu.VMEM((tm_sel, out_dim), jnp.float32),  # f32 accumulator
            ],
        ),
        compiler_params=pltpu.CompilerParams(
            dimension_semantics=("parallel", "arbitrary"),
            vmem_limit_bytes=vmem_limit,
        ),
        cost_estimate=pl.CostEstimate(
            flops=flops,
            transcendentals=M_pad * hidden_pad,
            bytes_accessed=bytes_accessed,
        ),
    )(x2d, gamma2, beta2, w1m, b1_2, w2m, b2_2)

    out = out[:M]
    return out.reshape(*lead_shape, out_dim)


# --------------------------------------------------------------------------- #
# Pure-JAX reference (matches the PyTorch module semantics)
# --------------------------------------------------------------------------- #
def mlp_reference(x, gamma, beta, w1, b1, w2, b2, use_residual=True):
    residual = x
    mean = jnp.mean(x, axis=-1, keepdims=True)
    var = jnp.mean((x - mean) ** 2, axis=-1, keepdims=True)
    xn = (x - mean) / jnp.sqrt(var + LN_EPS) * gamma + beta
    h = xn @ w1 + b1
    h = 0.5 * h * (1.0 + jax.lax.erf(h / jnp.sqrt(2.0)))
    y = h @ w2 + b2
    if use_residual:
        y = y + residual
    return y


if __name__ == "__main__":
    # Small shapes consistent with the module's forward: (batch, seq, in_dim).
    # hidden_dim=64 deliberately exercises the hidden-dim padding path (64 -> 128).
    batch, seq, in_dim, hidden_dim = 2, 8, 32, 64
    out_dim = in_dim  # use_residual=True requires in_dim == out_dim

    key = jax.random.PRNGKey(0)
    kx, kw1, kb1, kw2, kb2, kg, kb = jax.random.split(key, 7)

    x = jax.random.normal(kx, (batch, seq, in_dim), dtype=jnp.float32)

    # Deterministic synthetic parameters (shapes from __init__).
    gamma = 1.0 + 0.01 * jax.random.normal(kg, (in_dim,), dtype=jnp.float32)
    beta = 0.01 * jax.random.normal(kb, (in_dim,), dtype=jnp.float32)
    w1 = jax.random.normal(kw1, (in_dim, hidden_dim), dtype=jnp.float32) * 0.05
    b1 = jax.random.normal(kb1, (hidden_dim,), dtype=jnp.float32) * 0.01
    w2 = jax.random.normal(kw2, (hidden_dim, out_dim), dtype=jnp.float32) * 0.05
    b2 = jax.random.normal(kb2, (out_dim,), dtype=jnp.float32) * 0.01

    out = mlp_pallas(x, gamma, beta, w1, b1, w2, b2, use_residual=True)
    out = jax.block_until_ready(out)

    ref = mlp_reference(x, gamma, beta, w1, b1, w2, b2, use_residual=True)
    assert out.shape == (batch, seq, out_dim)
    # bf16 MXU operands with f32 accumulation vs pure-f32 reference -> loose tol.
    # NOTE: relative error grows with contraction length; verify tolerance at
    # production (4k/16k) dims before relying on this bound.
    assert jnp.allclose(out, ref, atol=2e-2, rtol=2e-2), \
        f"max err {jnp.max(jnp.abs(out - ref))}"

    print("KERNEL_OK")
</pallas_src>

<mosaic_0001>
module attributes {stable_mosaic.version = 11 : i64} {
  func.func @_mlp_kernel(%arg0: i32, %arg1: i32, %arg2: memref<16x32xf32, #tpu.memory_space<vmem>>, %arg3: memref<1x32xf32, #tpu.memory_space<vmem>>, %arg4: memref<1x32xf32, #tpu.memory_space<vmem>>, %arg5: memref<32x128xbf16, #tpu.memory_space<vmem>>, %arg6: memref<1x128xf32, #tpu.memory_space<vmem>>, %arg7: memref<128x32xbf16, #tpu.memory_space<vmem>>, %arg8: memref<1x32xf32, #tpu.memory_space<vmem>>, %arg9: memref<16x32xf32, #tpu.memory_space<vmem>>, %arg10: memref<16x32xbf16, #tpu.memory_space<vmem>>, %arg11: memref<16x32xf32, #tpu.memory_space<vmem>>) attributes {dimension_semantics = [#tpu.dimension_semantics<parallel>, #tpu.dimension_semantics<arbitrary>], iteration_bounds = array<i64: 1, 1>, scalar_prefetch = 0 : i64, scratch_operands = 2 : i64, tpu.core_type = #tpu.core_type<tc>, window_params = [{transform_indices = @transform_0, window_bounds = array<i64: 16, 32>}, {pipeline_mode = #tpu.pipeline_mode<synchronous>, transform_indices = @transform_1, window_bounds = array<i64: 1, 32>}, {pipeline_mode = #tpu.pipeline_mode<synchronous>, transform_indices = @transform_2, window_bounds = array<i64: 1, 32>}, {transform_indices = @transform_3, window_bounds = array<i64: 32, 128>}, {transform_indices = @transform_4, window_bounds = array<i64: 1, 128>}, {transform_indices = @transform_5, window_bounds = array<i64: 128, 32>}, {pipeline_mode = #tpu.pipeline_mode<synchronous>, transform_indices = @transform_6, window_bounds = array<i64: 1, 32>}, {transform_indices = @transform_7, window_bounds = array<i64: 16, 32>}]} {
    %c0_i32 = arith.constant 0 : i32
    %0 = arith.cmpi eq, %arg1, %c0_i32 : i32
    %1 = arith.extui %0 : i1 to i32
    %c0_i32_0 = arith.constant 0 : i32
    %2 = arith.cmpi ne, %1, %c0_i32_0 : i32
    scf.if %2 {
      %c0_18 = arith.constant 0 : index
      %c0_19 = arith.constant 0 : index
      %26 = vector.load %arg2[%c0_18, %c0_19] : memref<16x32xf32, #tpu.memory_space<vmem>>, vector<16x32xf32>
      %cst_20 = arith.constant dense<0.000000e+00> : vector<16xf32>
      %27 = vector.multi_reduction <add>, %26, %cst_20 [1] : vector<16x32xf32> to vector<16xf32>
      %28 = vector.shape_cast %27 : vector<16xf32> to vector<16x1xf32>
      %cst_21 = arith.constant 3.200000e+01 : f32
      %29 = vector.broadcast %cst_21 : f32 to vector<16x1xf32>
      %30 = arith.divf %28, %29 : vector<16x1xf32>
      %31 = vector.broadcast %30 : vector<16x1xf32> to vector<16x32xf32>
      %32 = arith.subf %26, %31 : vector<16x32xf32>
      %33 = arith.mulf %32, %32 : vector<16x32xf32>
      %cst_22 = arith.constant dense<0.000000e+00> : vector<16xf32>
      %34 = vector.multi_reduction <add>, %33, %cst_22 [1] : vector<16x32xf32> to vector<16xf32>
      %35 = vector.shape_cast %34 : vector<16xf32> to vector<16x1xf32>
      %cst_23 = arith.constant 3.200000e+01 : f32
      %36 = vector.broadcast %cst_23 : f32 to vector<16x1xf32>
      %37 = arith.divf %35, %36 : vector<16x1xf32>
      %cst_24 = arith.constant 9.99999974E-6 : f32
      %38 = vector.broadcast %cst_24 : f32 to vector<16x1xf32>
      %39 = arith.addf %37, %38 : vector<16x1xf32>
      %40 = math.rsqrt %39 : vector<16x1xf32>
      %41 = vector.broadcast %40 : vector<16x1xf32> to vector<16x32xf32>
      %42 = arith.mulf %32, %41 : vector<16x32xf32>
      %c0_25 = arith.constant 0 : index
      %c0_26 = arith.constant 0 : index
      %43 = vector.load %arg3[%c0_25, %c0_26] : memref<1x32xf32, #tpu.memory_space<vmem>>, vector<1x32xf32>
      %44 = vector.broadcast %43 : vector<1x32xf32> to vector<16x32xf32>
      %45 = arith.mulf %42, %44 : vector<16x32xf32>
      %c0_27 = arith.constant 0 : index
      %c0_28 = arith.constant 0 : index
      %46 = vector.load %arg4[%c0_27, %c0_28] : memref<1x32xf32, #tpu.memory_space<vmem>>, vector<1x32xf32>
      %47 = vector.broadcast %46 : vector<1x32xf32> to vector<16x32xf32>
      %48 = arith.addf %45, %47 : vector<16x32xf32>
      %49 = arith.truncf %48 : vector<16x32xf32> to vector<16x32xbf16>
      %c0_29 = arith.constant 0 : index
      %c0_30 = arith.constant 0 : index
      %50 = vector.load %arg10[%c0_29, %c0_30] : memref<16x32xbf16, #tpu.memory_space<vmem>>, vector<16x32xbf16>
      tpu.vector_store %arg10[%c0_29, %c0_30], %49 {strides = array<i32>} : memref<16x32xbf16, #tpu.memory_space<vmem>>, vector<16x32xbf16>,
      %cst_31 = arith.constant 0.000000e+00 : f32
      %51 = vector.broadcast %cst_31 : f32 to vector<16x32xf32>
      %c0_32 = arith.constant 0 : index
      %c0_33 = arith.constant 0 : index
      %52 = vector.load %arg11[%c0_32, %c0_33] : memref<16x32xf32, #tpu.memory_space<vmem>>, vector<16x32xf32>
      tpu.vector_store %arg11[%c0_32, %c0_33], %51 {strides = array<i32>} : memref<16x32xf32, #tpu.memory_space<vmem>>, vector<16x32xf32>,
    } else {
    }
    %c0 = arith.constant 0 : index
    %c0_1 = arith.constant 0 : index
    %3 = vector.load %arg10[%c0, %c0_1] : memref<16x32xbf16, #tpu.memory_space<vmem>>, vector<16x32xbf16>
    %c0_2 = arith.constant 0 : index
    %c0_3 = arith.constant 0 : index
    %4 = vector.load %arg5[%c0_2, %c0_3] : memref<32x128xbf16, #tpu.memory_space<vmem>>, vector<32x128xbf16>
    %cst = arith.constant dense<0.000000e+00> : vector<16x128xf32>
    %5 = tpu.matmul %3, %4, %cst {dimension_numbers = #tpu.dot_dimension_numbers<[1], [0], [0], [1], [0, 0, 1, 1], [], []>} : vector<16x32xbf16>, vector<32x128xbf16>, vector<16x128xf32> -> vector<16x128xf32>
    %c0_4 = arith.constant 0 : index
    %c0_5 = arith.constant 0 : index
    %6 = vector.load %arg6[%c0_4, %c0_5] : memref<1x128xf32, #tpu.memory_space<vmem>>, vector<1x128xf32>
    %7 = vector.broadcast %6 : vector<1x128xf32> to vector<16x128xf32>
    %8 = arith.addf %5, %7 : vector<16x128xf32>
    %cst_6 = arith.constant 5.000000e-01 : f32
    %9 = vector.broadcast %cst_6 : f32 to vector<16x128xf32>
    %10 = arith.mulf %9, %8 : vector<16x128xf32>
    %cst_7 = arith.constant 0.707106769 : f32
    %11 = vector.broadcast %cst_7 : f32 to vector<16x128xf32>
    %12 = arith.mulf %8, %11 : vector<16x128xf32>
    %13 = math.erf %12 : vector<16x128xf32>
    %cst_8 = arith.constant 1.000000e+00 : f32
    %14 = vector.broadcast %cst_8 : f32 to vector<16x128xf32>
    %15 = arith.addf %14, %13 : vector<16x128xf32>
    %16 = arith.mulf %10, %15 : vector<16x128xf32>
    %c0_9 = arith.constant 0 : index
    %c0_10 = arith.constant 0 : index
    %17 = vector.load %arg11[%c0_9, %c0_10] : memref<16x32xf32, #tpu.memory_space<vmem>>, vector<16x32xf32>
    %18 = arith.truncf %16 : vector<16x128xf32> to vector<16x128xbf16>
    %c0_11 = arith.constant 0 : index
    %c0_12 = arith.constant 0 : index
    %19 = vector.load %arg7[%c0_11, %c0_12] : memref<128x32xbf16, #tpu.memory_space<vmem>>, vector<128x32xbf16>
    %cst_13 = arith.constant dense<0.000000e+00> : vector<16x32xf32>
    %20 = tpu.matmul %18, %19, %cst_13 {dimension_numbers = #tpu.dot_dimension_numbers<[1], [0], [0], [1], [0, 0, 1, 1], [], []>} : vector<16x128xbf16>, vector<128x32xbf16>, vector<16x32xf32> -> vector<16x32xf32>
    %21 = arith.addf %17, %20 : vector<16x32xf32>
    %c0_14 = arith.constant 0 : index
    %c0_15 = arith.constant 0 : index
    %22 = vector.load %arg11[%c0_14, %c0_15] : memref<16x32xf32, #tpu.memory_space<vmem>>, vector<16x32xf32>
    tpu.vector_store %arg11[%c0_14, %c0_15], %21 {strides = array<i32>} : memref<16x32xf32, #tpu.memory_space<vmem>>, vector<16x32xf32>,
    %c0_i32_16 = arith.constant 0 : i32
    %23 = arith.cmpi eq, %arg1, %c0_i32_16 : i32
    %24 = arith.extui %23 : i1 to i32
    %c0_i32_17 = arith.constant 0 : i32
    %25 = arith.cmpi ne, %24, %c0_i32_17 : i32
    scf.if %25 {
      %c0_18 = arith.constant 0 : index
      %c0_19 = arith.constant 0 : index
      %26 = vector.load %arg11[%c0_18, %c0_19] : memref<16x32xf32, #tpu.memory_space<vmem>>, vector<16x32xf32>
      %c0_20 = arith.constant 0 : index
      %c0_21 = arith.constant 0 : index
      %27 = vector.load %arg8[%c0_20, %c0_21] : memref<1x32xf32, #tpu.memory_space<vmem>>, vector<1x32xf32>
      %28 = vector.broadcast %27 : vector<1x32xf32> to vector<16x32xf32>
      %29 = arith.addf %26, %28 : vector<16x32xf32>
      %c0_22 = arith.constant 0 : index
      %c0_23 = arith.constant 0 : index
      %30 = vector.load %arg2[%c0_22, %c0_23] : memref<16x32xf32, #tpu.memory_space<vmem>>, vector<16x32xf32>
      %31 = arith.addf %29, %30 : vector<16x32xf32>
      %c0_24 = arith.constant 0 : index
      %c0_25 = arith.constant 0 : index
      %32 = vector.load %arg9[%c0_24, %c0_25] : memref<16x32xf32, #tpu.memory_space<vmem>>, vector<16x32xf32>
      tpu.vector_store %arg9[%c0_24, %c0_25], %31 {strides = array<i32>} : memref<16x32xf32, #tpu.memory_space<vmem>>, vector<16x32xf32>,
    } else {
    }
    return
  }
  func.func @transform_0(%arg0: i32, %arg1: i32) -> (i32, i32) {
    %c0_i32 = arith.constant 0 : i32
    %c0_i32_0 = arith.constant 0 : i32
    return %arg0, %c0_i32 : i32, i32
  }
  func.func @transform_1(%arg0: i32, %arg1: i32) -> (i32, i32) {
    %c0_i32 = arith.constant 0 : i32
    %c0_i32_0 = arith.constant 0 : i32
    %c0_i32_1 = arith.constant 0 : i32
    return %c0_i32, %c0_i32_0 : i32, i32
  }
  func.func @transform_2(%arg0: i32, %arg1: i32) -> (i32, i32) {
    %c0_i32 = arith.constant 0 : i32
    %c0_i32_0 = arith.constant 0 : i32
    %c0_i32_1 = arith.constant 0 : i32
    return %c0_i32, %c0_i32_0 : i32, i32
  }
  func.func @transform_3(%arg0: i32, %arg1: i32) -> (i32, i32) {
    %c0_i32 = arith.constant 0 : i32
    %c0_i32_0 = arith.constant 0 : i32
    return %c0_i32, %arg1 : i32, i32
  }
  func.func @transform_4(%arg0: i32, %arg1: i32) -> (i32, i32) {
    %c0_i32 = arith.constant 0 : i32
    %c0_i32_0 = arith.constant 0 : i32
    return %c0_i32, %arg1 : i32, i32
  }
  func.func @transform_5(%arg0: i32, %arg1: i32) -> (i32, i32) {
    %c0_i32 = arith.constant 0 : i32
    %c0_i32_0 = arith.constant 0 : i32
    return %arg1, %c0_i32 : i32, i32
  }
  func.func @transform_6(%arg0: i32, %arg1: i32) -> (i32, i32) {
    %c0_i32 = arith.constant 0 : i32
    %c0_i32_0 = arith.constant 0 : i32
    %c0_i32_1 = arith.constant 0 : i32
    return %c0_i32, %c0_i32_0 : i32, i32
  }
  func.func @transform_7(%arg0: i32, %arg1: i32) -> (i32, i32) {
    %c0_i32 = arith.constant 0 : i32
    %c0_i32_0 = arith.constant 0 : i32
    return %arg0, %c0_i32 : i32, i32
  }
}

</mosaic_0001>

<bundles_post_ra>
// kernel: tpu_custom_call.1
= control target key start
LH: loop header
LB: loop body
LE: loop exit
PB: predicated region body
PF: predicated region fallthrough
CT: control target
= control target key end

     0   :  { %vm34_vm0 = vcmask 261120   ;;  %s540_s0 = inlined_call_operand.vmem [shape: f32[16,32], index: 0, kind: input, shape index: {}]   ;;  %s541_s1 = inlined_call_operand.vmem [shape: f32[1,32], index: 1, kind: input, shape index: {}]   ;;  %s542_s2 = inlined_call_operand.vmem [shape: f32[1,32], index: 2, kind: input, shape index: {}]   ;;  %s543_s3 = inlined_call_operand.vmem [shape: bf16[32,128], index: 3, kind: input, shape index: {}]   ;;  %s544_s4 = inlined_call_operand.vmem [shape: f32[1,128], index: 4, kind: input, shape index: {}]   ;;  %s545_s5 = inlined_call_operand.vmem [shape: bf16[128,32], index: 5, kind: input, shape index: {}]   ;;  %s546_s6 = inlined_call_operand.vmem [shape: f32[1,32], index: 6, kind: input, shape index: {}]   ;;  %s547_s7 = inlined_call_operand.hbm [shape: f32[16,32], index: 7, kind: output, shape index: {}]  }
   0x1   :  { %v461_v0 = vld [vmem:[%s540_s0] sm:$0xff]  ;;  %v466_v1 = vld [vmem:[%s540_s0 + $0x8] sm:$0xff] }
   0x2   :  { %v35_v2 = vsel %vm34_vm0, %v461_v0, 0.0  ;;  %v38_v3 = vsel %vm34_vm0, %v466_v1, 0.0 }
   0x3   :  { %36 = vadd.xlane.f32.xlu0 %v35_v2 }
   0x7   :  { %39 = vadd.xlane.f32.xlu0 %v38_v3 }
   0x8   :  { %12 = vsyncpa [#allocation5], 0  ;;  %v371_v14 = vld [vmem:[%s543_s3] sm:$0xff]   ;;  %v413_v15 = vmov 0.0   ;;  %v372_v16 = vld [vmem:[%s543_s3 + $0x8] sm:$0xff]   ;;  %vm414_vm1 = vmmov 0  }
   0x9   :  { %338 = vmatprep.subr.bf16.mxu0 %v413_v15  ;;  %82 = vst.msk [vmem:[#allocation3] sm:$0xff] %vm34_vm0, %v413_v15  ;;  %83 = vst.msk [vmem:[#allocation3 + $0x8] sm:$0xff] %vm34_vm0, %v413_v15  ;;  %346 = vmatprep.subr.bf16.mxu1 %v413_v15  ;;  %v373_v17 = vld [vmem:[%s545_s5] sm:$0xff]   ;;  %v374_v18 = vld [vmem:[%s545_s5 + $0x8] sm:$0xff]   ;;  %s415_s27 = smov [#allocation4]  }
   0xa   :  { %339 = vmatpush3.bf16.msra.mxu0 %v371_v14  ;;  %342 = vmatprep.mubr.msk.bf16.mxu0 %vm414_vm1, %v413_v15  ;;  %v311_v27 = vld [vmem:[%s541_s1] ss:$0 sm:$0xff]  ;;  %v375_v37 = vld [vmem:[%s545_s5 + $0x10] sm:$0xff]   ;;  %v376_v38 = vld [vmem:[%s545_s5 + $0x18] sm:$0xff]   ;;  %s300_s0 = sshll.u32 %s415_s27, 4  ;;  %s301_s0 = int_to_ptr.vmem [resolvable:$true] %s300_s0 }
   0xb   :  { %340 = vmatprep.subr.bf16.mxu0 %v413_v15  ;;  %362 = vmatprep.mubr.msk.bf16.mxu1 %vm414_vm1, %v413_v15  ;;  %v312_v31 = vld [vmem:[%s542_s2] ss:$0 sm:$0xff]  ;;  %v378_v40 = vld [vmem:[%s545_s5 + $0x28] sm:$0xff]   ;;  %v379_v41 = vld [vmem:[%s545_s5 + $0x30] sm:$0xff]   ;;  %s389_s28 = scalar_lea.vmem %s301_s0, 256  ;;  %p394_p1 = scmp.lt.s32.totalorder %s301_s0, %s301_s0 }
   0xc   :  { %347 = vmatpush3.bf16.msra.mxu1 %v373_v17  ;;  %v377_v39 = vld [vmem:[%s545_s5 + $0x20] sm:$0xff]   ;;  %v380_v42 = vld [vmem:[%s545_s5 + $0x38] sm:$0xff]   ;;  %p390_p0 = scmp.ne.s32.totalorder %s301_s0, %s389_s28  ;;  %p395_p2 = scmp.lt.s32.totalorder %s389_s28, %s389_s28 }
   0xd   :  { %348 = vmatprep.subr.bf16.mxu1 %v413_v15  ;;  %v313_v43 = vld [vmem:[%s544_s4] ss:$0 sm:$0xff] }
   0xe   :  { %341 = vmatpush3.bf16.msra.mxu0 %v372_v16  ;;  %p396_p3 = por %p395_p2, %p394_p1 }
  0x10   :  { %349 = vmatpush3.bf16.msra.mxu1 %v374_v18  ;;  %v163_v61 = vld [vmem:[#allocation3] sm:$0xff]  ;;  %v164_v63 = vld [vmem:[#allocation3 + $0x8] sm:$0xff]  ;;  %p397_p4 = pnand %p396_p3, %p390_p0 }
  0x11   :  { %350 = vmatprep.subr.bf16.mxu1 %v413_v15 }
  0x14   :  { %351 = vmatpush3.bf16.msra.mxu1 %v375_v37 }
  0x15   :  { %352 = vmatprep.subr.bf16.mxu1 %v413_v15 }
  0x18   :  { %353 = vmatpush3.bf16.msra.mxu1 %v376_v38 }
  0x19   :  { %354 = vmatprep.subr.bf16.mxu1 %v413_v15 }
  0x1c   :  { %355 = vmatpush3.bf16.msra.mxu1 %v377_v39 }
  0x1d   :  { %356 = vmatprep.subr.bf16.mxu1 %v413_v15 }
  0x20   :  { %357 = vmatpush3.bf16.msra.mxu1 %v378_v40 }
  0x21   :  { %358 = vmatprep.subr.bf16.mxu1 %v413_v15 }
  0x24   :  { %359 = vmatpush3.bf16.msra.mxu1 %v379_v41 }
  0x25   :  { %360 = vmatprep.subr.bf16.mxu1 %v413_v15 }
  0x28   :  { %361 = vmatpush3.bf16.msra.mxu1 %v380_v42 }
  0x90   :  { %v37_v4 = vpop.xlane.xlu0 %36 }
  0x91   :  { %v42_v5 = vmul.f32 0.03125, %v37_v4 }
  0x93   :  { %v44_v6 = vsub.f32 %v461_v0, %v42_v5 }
  0x94   :  { %v40_v7 = vpop.xlane.xlu0 %39 }
  0x95   :  { %v43_v8 = vmul.f32 0.03125, %v40_v7  ;;  %v46_v9 = vmul.f32 %v44_v6, %v44_v6  ;;  %v325_v7 = vld [vmem:[%s546_s6] ss:$0 sm:$0xff] }
  0x97   :  { %v45_v10 = vsub.f32 %v466_v1, %v43_v8  ;;  %v48_v11 = vsel %vm34_vm0, %v46_v9, 0.0 }
  0x98   :  { %49 = vadd.xlane.f32.xlu1 %v48_v11 }
  0x99   :  { %v47_v12 = vmul.f32 %v45_v10, %v45_v10 }
  0x9b   :  { %v51_v13 = vsel %vm34_vm0, %v47_v12, 0.0 }
  0x9c   :  { %52 = vadd.xlane.f32.xlu1 %v51_v13 }
 0x125   :  { %v50_v19 = vpop.xlane.xlu1 %49 }
 0x126   :  { %v54_v20 = vmul.f32 0.03125, %v50_v19 }
 0x128   :  { %v56_v21 = vadd.f32 1e-05, %v54_v20 }
 0x129   :  { %v53_v22 = vpop.xlane.xlu1 %52 }
 0x12a   :  { %381 = vrsqrt.f32 %v56_v21  ;;  %v55_v23 = vmul.f32 0.03125, %v53_v22 }
 0x12c   :  { %v57_v24 = vadd.f32 1e-05, %v55_v23 }
 0x12e   :  { %383 = vrsqrt.f32 %v57_v24 }
 0x134   :  { %v382_v25 = vpop.eup %381 }
 0x135   :  { %v60_v26 = vmul.f32 %v382_v25, %v44_v6 }
 0x137   :  { %v69_v29 = vmul.f32 %v311_v27, %v60_v26 }
 0x138   :  { %v384_v28 = vpop.eup %383 }
 0x139   :  { %v61_v30 = vmul.f32 %v384_v28, %v45_v10  ;;  %v78_v33 = vadd.f32 %v312_v31, %v69_v29 }
 0x13b   :  { %v70_v32 = vmul.f32 %v311_v27, %v61_v30 }
 0x13d   :  { %v79_v34 = vadd.f32 %v312_v31, %v70_v32 }
 0x13f   :  { %v80_v35 = vpack.c.bf16 %v79_v34, %v78_v33 }
 0x141   :  { %81 = vst.msk [vmem:[#allocation2] sm:$0xff] %vm34_vm0, %v80_v35 }
 0x148   :  { %v84_v36 = vld [vmem:[#allocation2] sm:$0xff] }
 0x149   :  { %343 = vmatmul.mubr.msk.bf16.vlgmr.msra.gmra.mrb[0].mxu0 %vm34_vm0, %v84_v36 }
 0x21c   :  { %v146_v44 = vpop.f32.mrb[0].mxu0 }
 0x21d   :  { %v147_v45 = vadd.f32 %v313_v43, %v146_v44  ;;  %v344_v46 = vpop.f32.mrb[1].mxu0 }
 0x21e   :  { %v149_v47 = vpop.f32.mrb[2].mxu0 }
 0x21f   :  { %v155_v48 = vmul.f32 0.70710677, %v147_v45  ;;  %v150_v49 = vadd.f32 %v313_v43, %v149_v47  ;;  %v345_v50 = vpop.f32.mrb[3].mxu0  ;;  %v153_v55 = vmul.f32 0.5, %v147_v45 }
 0x221   :  { %385 = verf.f32 %v155_v48  ;;  %v156_v51 = vmul.f32 0.70710677, %v150_v49  ;;  %v154_v56 = vmul.f32 0.5, %v150_v49 }
 0x223   :  { %387 = verf.f32 %v156_v51 }
 0x22b   :  { %v386_v52 = vpop.eup %385 }
 0x22c   :  { %v159_v53 = vadd.f32 1.0, %v386_v52 }
 0x22d   :  { %v388_v54 = vpop.eup %387 }
 0x22e   :  { %v160_v57 = vadd.f32 1.0, %v388_v54  ;;  %v161_v58 = vmul.f32 %v159_v53, %v153_v55 }
 0x230   :  { %v162_v59 = vmul.f32 %v160_v57, %v154_v56 }
 0x232   :  { %v165_v60 = vpack.c.bf16 %v162_v59, %v161_v58 }
 0x234   :  { %363 = vmatmul.mubr.bf16.vlgmr.msra.gmra.mrb[0].mxu1 %v165_v60 }
 0x307   :  { %v264_v62 = vpop.f32.mrb[0].mxu1 }
 0x308   :  { %v271_v2 = vadd.f32 %v264_v62, %v163_v61  ;;  %v364_v3 = vpop.f32.mrb[1].mxu1 }
 0x309   :  { %v267_v4 = vpop.f32.mrb[2].mxu1 }
 0x30a   :  { %273 = vst.msk [vmem:[#allocation3] sm:$0xff] %vm34_vm0, %v271_v2  ;;  %v272_v5 = vadd.f32 %v267_v4, %v164_v63  ;;  %v365_v6 = vpop.f32.mrb[3].mxu1 }
 0x30c   :  { %274 = vst.msk [vmem:[#allocation3 + $0x8] sm:$0xff] %vm34_vm0, %v272_v5 }
 0x311   :  { %v278_v8 = vld [vmem:[#allocation3] sm:$0xff] }
 0x312   :  { %v287_v9 = vadd.f32 %v325_v7, %v278_v8 }
 0x313   :  { %v279_v10 = vld [vmem:[#allocation3 + $0x8] sm:$0xff] }
 0x314   :  { %v288_v11 = vadd.f32 %v325_v7, %v279_v10  ;;  %v291_v12 = vadd.f32 %v287_v9, %v461_v0 }
 0x316   :  { %v292_v13 = vadd.f32 %v288_v11, %v466_v1  ;;  %293 = vst.msk [vmem:[#allocation4] sm:$0xff] %vm34_vm0, %v291_v12 }
 0x318   :  { %294 = vst.msk [vmem:[#allocation4 + $0x8] sm:$0xff] %vm34_vm0, %v292_v13 }
 0x319   :  { %400 = shalt.err (!%p397_p4)
}
 0x31a   :  { %s401_s30 = scalar_lea.hbm %s547_s7, 256 }
 0x31b   :  { %p402_p5 = scmp.ne.s32.totalorder %s547_s7, %s401_s30  ;;  %p405_p6 = scmp.lt.u32.totalorder %s401_s30, %s547_s7 }
 0x31d   :  { %p407_p7 = pnand %p405_p6, %p402_p5 }
 0x31f   :  { %410 = shalt.err (!%p407_p7)
}
 0x320   :  { %s416_s3 = smov 128   ;;  %s417_s12 = smov 8  }
 0x321   :  { %306 = dma.vmem_to_hbm [thread:$0]  %s301_s0, 256, %s547_s7, [#allocation5], %s416_s3, %s416_s3, %s417_s12  }
 0x322   :  { %411 = dma.done.wait [#allocation5], 256  }
 0x323   :  { %412 = vsyncadd [#allocation5], 4294967040 }
 0x324   :  { %310 = vsyncpa [#allocation5], 1 }

</bundles_post_ra>
